<compile_context>
chip_gen: v7x
topology: tpu7x:2x2x1
jax: 0.10.0
libtpu: 0.0.40
codegen_flags: <defaults>
</compile_context>

<pallas_src>
import functools

import jax
import jax.numpy as jnp
from jax.experimental import pallas as pl
from jax.experimental.pallas import tpu as pltpu


def se_block_kernel(x_ref, w1t_ref, b1_ref, w2t_ref, b2_ref, alpha_ref, o_ref,
                    *, inv_hw):
    # ---- squeeze: global average pool over the (lane) spatial axis ----
    # First explicit VMEM read of the block; pad columns are zero so the sum
    # is exact, and inv_hw uses the TRUE (unpadded) spatial size.
    pooled = jnp.sum(x_ref[...].astype(jnp.float32), axis=-1) * inv_hw   # (Bt, C)

    # ---- excitation: Linear(C->Cr) + PReLU + Linear(Cr->C) + Sigmoid ----
    # Weights arrive pre-transposed: w1t is (C, Cr), w2t is (Cr, C).
    # These dots massively under-fill the MXU but are entirely off the
    # critical path (kernel is HBM streaming bound) -- leave them simple.
    h = jnp.dot(pooled, w1t_ref[...],
                preferred_element_type=jnp.float32) + b1_ref[...]        # (Bt, Cr)
    alpha = alpha_ref[0]                                                 # scalar (SMEM)
    h = jnp.where(h > 0, h, alpha * h)                                   # PReLU
    y = jnp.dot(h, w2t_ref[...],
                preferred_element_type=jnp.float32) + b2_ref[...]        # (Bt, C)
    gate = jax.nn.sigmoid(y)                                             # (Bt, C) f32

    # ---- scale: broadcast channel gates over spatial positions ----
    # Second explicit VMEM read of x keeps this a clean stream (no long-lived
    # multi-hundred-vreg value held across the excitation).
    o_ref[...] = x_ref[...] * gate[:, :, None].astype(o_ref.dtype)


def _tensorcores_per_chip():
    """1 for v5e/v6e, 2 for v7x. Fails safe to 1."""
    try:
        kind = (jax.devices()[0].device_kind or "").lower()
        if "v7" in kind or "7x" in kind:
            return 2
    except Exception:
        pass
    return 1


def _choose_batch_tile(B, per_sample_bytes, num_cores,
                       target_block_bytes=4 * 1024 * 1024):
    """Pick Bt (a divisor of B) so each (Bt, C, HW_pad) block is ~<= 4 MiB.

    Single-TC chips: largest divisor that fits the target (one big block is
    strictly better than several small ones -- the grid is a serial loop).
    Multi-TC chips (v7x): additionally prefer an even grid-step count that is
    a multiple of the core count, so both TensorCores stay balanced.
    """
    target_bt = max(1, target_block_bytes // max(per_sample_bytes, 1))
    divisors = [d for d in range(1, B + 1) if B % d == 0]
    fitting = [d for d in divisors if d <= target_bt]
    if not fitting:
        return 1
    bt = max(fitting)
    if num_cores >= 2:
        balanced = [d for d in fitting
                    if (B // d) >= num_cores and (B // d) % num_cores == 0]
        if balanced:
            bt = max(balanced)
        else:
            at_least = [d for d in fitting if (B // d) >= num_cores]
            if at_least:
                bt = max(at_least)
    return bt


def se_block(x_nchw, w1, b1, w2, b2, alpha):
    """x_nchw: (B, C, H, W).  Returns (B, C, H, W), same dtype as x."""
    B, C, H, W = x_nchw.shape
    Cr = w1.shape[0]
    HW = H * W
    HW_pad = ((HW + 127) // 128) * 128          # lane-dense output slab
    itemsize = jnp.dtype(x_nchw.dtype).itemsize

    x3 = x_nchw.reshape(B, C, HW)
    if HW_pad != HW:
        x3 = jnp.pad(x3, ((0, 0), (0, 0), (0, HW_pad - HW)))

    w1t = jnp.transpose(w1).astype(jnp.float32)      # (C, Cr), transposed once
    w2t = jnp.transpose(w2).astype(jnp.float32)      # (Cr, C)
    b1_2d = b1.reshape(1, Cr).astype(jnp.float32)
    b2_2d = b2.reshape(1, C).astype(jnp.float32)
    alpha_1d = alpha.reshape(1).astype(jnp.float32)  # scalar PReLU slope -> SMEM

    num_cores = _tensorcores_per_chip()
    per_sample_bytes = C * HW_pad * itemsize
    Bt = _choose_batch_tile(B, per_sample_bytes, num_cores)
    grid = (B // Bt,)

    # VMEM budget: pipeline holds ~2x(in block) + 2x(out block) + 2x weights.
    block_bytes = Bt * C * HW_pad * itemsize
    weight_bytes = 2 * 4 * (C * Cr + Cr + Cr * C + C)
    vmem_needed = 4 * block_bytes + weight_bytes + (2 << 20)   # + headroom
    VMEM_SAFE_CAP = 48 << 20          # <= v7x 64 MiB/TC physical, fine on v5e/v6e
    # TODO(synk): for very large C*HW where even a single-sample block blows
    # the budget, add a second 'arbitrary' grid axis over HW with a two-pass
    # sum-then-scale scheme; not needed at these shapes.
    assert 4 * per_sample_bytes + weight_bytes <= VMEM_SAFE_CAP, (
        "single-sample SE block does not fit VMEM; needs an HW grid axis")
    vmem_limit = int(min(max(vmem_needed, 8 << 20), VMEM_SAFE_CAP))

    cost = pl.CostEstimate(
        flops=2 * B * (C * Cr + Cr * C) + 2 * B * C * HW,
        transcendentals=B * C,
        bytes_accessed=2 * B * C * HW_pad * itemsize,
    )

    kernel = functools.partial(se_block_kernel, inv_hw=1.0 / HW)

    out3 = pl.pallas_call(
        kernel,
        out_shape=jax.ShapeDtypeStruct((B, C, HW_pad), x3.dtype),
        grid_spec=pltpu.PrefetchScalarGridSpec(
            num_scalar_prefetch=0,
            grid=grid,
            in_specs=[
                pl.BlockSpec((Bt, C, HW_pad), lambda b: (b, 0, 0)),  # x block
                pl.BlockSpec((C, Cr), lambda b: (0, 0)),             # fc1 weight^T
                pl.BlockSpec((1, Cr), lambda b: (0, 0)),             # fc1 bias
                pl.BlockSpec((Cr, C), lambda b: (0, 0)),             # fc2 weight^T
                pl.BlockSpec((1, C), lambda b: (0, 0)),              # fc2 bias
                pl.BlockSpec(memory_space=pltpu.MemorySpace.SMEM),   # PReLU alpha
            ],
            out_specs=pl.BlockSpec((Bt, C, HW_pad), lambda b: (b, 0, 0)),
        ),
        compiler_params=pltpu.CompilerParams(
            dimension_semantics=("parallel",),
            vmem_limit_bytes=vmem_limit),
        cost_estimate=cost,
    )(x3, w1t, b1_2d, w2t, b2_2d, alpha_1d)

    if HW_pad != HW:
        out3 = out3[:, :, :HW]
    return out3.reshape(B, C, H, W)


def reference_se_block(x, w1, b1, w2, b2, alpha):
    """Pure-JAX reference matching the PyTorch forward."""
    y = jnp.mean(x, axis=(2, 3))                          # (B, C)
    h = y @ w1.T + b1                                     # (B, Cr)
    h = jnp.where(h > 0, h, alpha * h)                    # PReLU (scalar, torch default)
    g = jax.nn.sigmoid(h @ w2.T + b2)                     # (B, C)
    return x * g[:, :, None, None]


if __name__ == "__main__":
    key = jax.random.PRNGKey(0)

    B, C, H, W = 2, 32, 16, 16
    reduction = 16
    Cr = C // reduction

    k_x, k_w1, k_b1, k_w2, k_b2 = jax.random.split(key, 5)

    x = jax.random.normal(k_x, (B, C, H, W), dtype=jnp.float32)

    # Deterministic parameter init (uniform like torch Linear default scale).
    lim1 = 1.0 / jnp.sqrt(C)
    w1 = jax.random.uniform(k_w1, (Cr, C), jnp.float32, -lim1, lim1)
    b1 = jax.random.uniform(k_b1, (Cr,), jnp.float32, -lim1, lim1)
    lim2 = 1.0 / jnp.sqrt(Cr)
    w2 = jax.random.uniform(k_w2, (C, Cr), jnp.float32, -lim2, lim2)
    b2 = jax.random.uniform(k_b2, (C,), jnp.float32, -lim2, lim2)
    alpha = jnp.array(0.25, dtype=jnp.float32)            # nn.PReLU() default

    out = se_block(x, w1, b1, w2, b2, alpha)
    jax.block_until_ready(out)

    ref = reference_se_block(x, w1, b1, w2, b2, alpha)
    assert out.shape == (B, C, H, W)
    assert jnp.allclose(out, ref, atol=1e-5, rtol=1e-5)

    # Also exercise a non-128-multiple spatial size (HW padding path).
    x2 = jax.random.normal(k_x, (B, C, 7, 7), dtype=jnp.float32)
    out2 = se_block(x2, w1, b1, w2, b2, alpha)
    jax.block_until_ready(out2)
    ref2 = reference_se_block(x2, w1, b1, w2, b2, alpha)
    assert jnp.allclose(out2, ref2, atol=1e-5, rtol=1e-5)

    print("KERNEL_OK")
</pallas_src>

<mosaic_0001>
module attributes {stable_mosaic.version = 11 : i64} {
  func.func @se_block_kernel(%arg0: i32, %arg1: memref<2x32x256xf32, #tpu.memory_space<vmem>>, %arg2: memref<32x2xf32, #tpu.memory_space<vmem>>, %arg3: memref<1x2xf32, #tpu.memory_space<vmem>>, %arg4: memref<2x32xf32, #tpu.memory_space<vmem>>, %arg5: memref<1x32xf32, #tpu.memory_space<vmem>>, %arg6: memref<1xf32, #tpu.memory_space<smem>>, %arg7: memref<2x32x256xf32, #tpu.memory_space<vmem>>) attributes {dimension_semantics = [#tpu.dimension_semantics<parallel>], iteration_bounds = array<i64: 1>, scalar_prefetch = 0 : i64, scratch_operands = 0 : i64, tpu.core_type = #tpu.core_type<tc>, window_params = [{transform_indices = @transform_0, window_bounds = array<i64: 2, 32, 256>}, {pipeline_mode = #tpu.pipeline_mode<synchronous>, transform_indices = @transform_1, window_bounds = array<i64: 32, 2>}, {pipeline_mode = #tpu.pipeline_mode<synchronous>, transform_indices = @transform_2, window_bounds = array<i64: 1, 2>}, {pipeline_mode = #tpu.pipeline_mode<synchronous>, transform_indices = @transform_3, window_bounds = array<i64: 2, 32>}, {pipeline_mode = #tpu.pipeline_mode<synchronous>, transform_indices = @transform_4, window_bounds = array<i64: 1, 32>}, {transform_indices = @transform_5, window_bounds = array<i64: 1>}, {transform_indices = @transform_6, window_bounds = array<i64: 2, 32, 256>}]} {
    %c0 = arith.constant 0 : index
    %c0_0 = arith.constant 0 : index
    %c0_1 = arith.constant 0 : index
    %0 = vector.load %arg1[%c0, %c0_0, %c0_1] : memref<2x32x256xf32, #tpu.memory_space<vmem>>, vector<2x32x256xf32>
    %cst = arith.constant dense<0.000000e+00> : vector<2x32xf32>
    %1 = vector.multi_reduction <add>, %0, %cst [2] : vector<2x32x256xf32> to vector<2x32xf32>
    %cst_2 = arith.constant 3.906250e-03 : f32
    %2 = vector.broadcast %cst_2 : f32 to vector<2x32xf32>
    %3 = arith.mulf %1, %2 : vector<2x32xf32>
    %c0_3 = arith.constant 0 : index
    %c0_4 = arith.constant 0 : index
    %4 = vector.load %arg2[%c0_3, %c0_4] : memref<32x2xf32, #tpu.memory_space<vmem>>, vector<32x2xf32>
    %cst_5 = arith.constant dense<0.000000e+00> : vector<2x2xf32>
    %5 = tpu.matmul %3, %4, %cst_5 {dimension_numbers = #tpu.dot_dimension_numbers<[1], [0], [0], [1], [0, 0, 1, 1], [], []>} : vector<2x32xf32>, vector<32x2xf32>, vector<2x2xf32> -> vector<2x2xf32>
    %c0_6 = arith.constant 0 : index
    %c0_7 = arith.constant 0 : index
    %6 = vector.load %arg3[%c0_6, %c0_7] : memref<1x2xf32, #tpu.memory_space<vmem>>, vector<1x2xf32>
    %7 = vector.broadcast %6 : vector<1x2xf32> to vector<2x2xf32>
    %8 = arith.addf %5, %7 : vector<2x2xf32>
    %c0_8 = arith.constant 0 : index
    %9 = memref.load %arg6[%c0_8] : memref<1xf32, #tpu.memory_space<smem>>
    %cst_9 = arith.constant 0.000000e+00 : f32
    %10 = vector.broadcast %cst_9 : f32 to vector<2x2xf32>
    %11 = arith.cmpf ogt, %8, %10 : vector<2x2xf32>
    %12 = vector.broadcast %9 : f32 to vector<2x2xf32>
    %13 = arith.mulf %12, %8 : vector<2x2xf32>
    %14 = arith.select %11, %8, %13 : vector<2x2xi1>, vector<2x2xf32>
    %c0_10 = arith.constant 0 : index
    %c0_11 = arith.constant 0 : index
    %15 = vector.load %arg4[%c0_10, %c0_11] : memref<2x32xf32, #tpu.memory_space<vmem>>, vector<2x32xf32>
    %cst_12 = arith.constant dense<0.000000e+00> : vector<2x32xf32>
    %16 = tpu.matmul %14, %15, %cst_12 {dimension_numbers = #tpu.dot_dimension_numbers<[1], [0], [0], [1], [0, 0, 1, 1], [], []>} : vector<2x2xf32>, vector<2x32xf32>, vector<2x32xf32> -> vector<2x32xf32>
    %c0_13 = arith.constant 0 : index
    %c0_14 = arith.constant 0 : index
    %17 = vector.load %arg5[%c0_13, %c0_14] : memref<1x32xf32, #tpu.memory_space<vmem>>, vector<1x32xf32>
    %18 = vector.broadcast %17 : vector<1x32xf32> to vector<2x32xf32>
    %19 = arith.addf %16, %18 : vector<2x32xf32>
    %20 = arith.negf %19 : vector<2x32xf32>
    %21 = math.exp %20 : vector<2x32xf32>
    %cst_15 = arith.constant 1.000000e+00 : f32
    %22 = vector.broadcast %cst_15 : f32 to vector<2x32xf32>
    %23 = arith.addf %22, %21 : vector<2x32xf32>
    %24 = arith.divf %22, %23 : vector<2x32xf32>
    %c0_16 = arith.constant 0 : index
    %c0_17 = arith.constant 0 : index
    %c0_18 = arith.constant 0 : index
    %25 = vector.load %arg1[%c0_16, %c0_17, %c0_18] : memref<2x32x256xf32, #tpu.memory_space<vmem>>, vector<2x32x256xf32>
    %26 = vector.shape_cast %24 : vector<2x32xf32> to vector<2x32x1xf32>
    %27 = vector.broadcast %26 : vector<2x32x1xf32> to vector<2x32x256xf32>
    %28 = arith.mulf %25, %27 : vector<2x32x256xf32>
    %c0_19 = arith.constant 0 : index
    %c0_20 = arith.constant 0 : index
    %c0_21 = arith.constant 0 : index
    %29 = vector.load %arg7[%c0_19, %c0_20, %c0_21] : memref<2x32x256xf32, #tpu.memory_space<vmem>>, vector<2x32x256xf32>
    tpu.vector_store %arg7[%c0_19, %c0_20, %c0_21], %28 {strides = array<i32>} : memref<2x32x256xf32, #tpu.memory_space<vmem>>, vector<2x32x256xf32>,
    return
  }
  func.func @transform_0(%arg0: i32) -> (i32, i32, i32) {
    %c0_i32 = arith.constant 0 : i32
    %c0_i32_0 = arith.constant 0 : i32
    %c0_i32_1 = arith.constant 0 : i32
    return %arg0, %c0_i32, %c0_i32_0 : i32, i32, i32
  }
  func.func @transform_1(%arg0: i32) -> (i32, i32) {
    %c0_i32 = arith.constant 0 : i32
    %c0_i32_0 = arith.constant 0 : i32
    %c0_i32_1 = arith.constant 0 : i32
    return %c0_i32, %c0_i32_0 : i32, i32
  }
  func.func @transform_2(%arg0: i32) -> (i32, i32) {
    %c0_i32 = arith.constant 0 : i32
    %c0_i32_0 = arith.constant 0 : i32
    %c0_i32_1 = arith.constant 0 : i32
    return %c0_i32, %c0_i32_0 : i32, i32
  }
  func.func @transform_3(%arg0: i32) -> (i32, i32) {
    %c0_i32 = arith.constant 0 : i32
    %c0_i32_0 = arith.constant 0 : i32
    %c0_i32_1 = arith.constant 0 : i32
    return %c0_i32, %c0_i32_0 : i32, i32
  }
  func.func @transform_4(%arg0: i32) -> (i32, i32) {
    %c0_i32 = arith.constant 0 : i32
    %c0_i32_0 = arith.constant 0 : i32
    %c0_i32_1 = arith.constant 0 : i32
    return %c0_i32, %c0_i32_0 : i32, i32
  }
  func.func @transform_5(%arg0: i32) -> i32 {
    %c0_i32 = arith.constant 0 : i32
    %c0_i32_0 = arith.constant 0 : i32
    return %c0_i32 : i32
  }
  func.func @transform_6(%arg0: i32) -> (i32, i32, i32) {
    %c0_i32 = arith.constant 0 : i32
    %c0_i32_0 = arith.constant 0 : i32
    %c0_i32_1 = arith.constant 0 : i32
    return %arg0, %c0_i32, %c0_i32_0 : i32, i32, i32
  }
}

</mosaic_0001>

<bundles_post_ra>
// kernel: tpu_custom_call.1
= control target key start
LH: loop header
LB: loop body
LE: loop exit
PB: predicated region body
PF: predicated region fallthrough
CT: control target
= control target key end

     0   :  { %12 = vsyncpa [#allocation4], 0  ;;  %s673_s0 = inlined_call_operand.hbm [shape: f32[2,32,256], index: 0, kind: input, shape index: {}]   ;;  %s674_s1 = inlined_call_operand.vmem [shape: f32[32,2], index: 1, kind: input, shape index: {}]   ;;  %s675_s2 = inlined_call_operand.vmem [shape: f32[1,2], index: 2, kind: input, shape index: {}]   ;;  %s676_s3 = inlined_call_operand.vmem [shape: f32[2,32], index: 3, kind: input, shape index: {}]   ;;  %s677_s4 = inlined_call_operand.vmem [shape: f32[1,32], index: 4, kind: input, shape index: {}]   ;;  %s678_s5 = inlined_call_operand.<no memory space> [shape: f32[1], index: 5, kind: input, shape index: {}]   ;;  %s679_s6 = inlined_call_operand.hbm [shape: f32[2,32,256], index: 6, kind: output, shape index: {}]  }
   0x1   :  { %13 = vsyncpa [#allocation5], 0  ;;  %s505_s21 = smov [#allocation3]   ;;  %s457_s25 = scalar_lea.hbm %s673_s0, 2048 }
   0x2   :  { %s19_s22 = sshll.u32 %s505_s21, 4  ;;  %p458_p0 = scmp.ne.s32.totalorder %s673_s0, %s457_s25  ;;  %s20_s22 = int_to_ptr.vmem [resolvable:$true] %s19_s22 }
   0x3   :  { %p461_p1 = scmp.lt.u32.totalorder %s457_s25, %s673_s0 }
   0x5   :  { %p463_p2 = pnand %p461_p1, %p458_p0 }
   0x7   :  { %466 = shalt.err (!%p463_p2)
}
   0x8   :  { %s467_s30 = scalar_lea.vmem %s20_s22, 2048  ;;  %p472_p4 = scmp.lt.s32.totalorder %s20_s22, %s20_s22 }
   0x9   :  { %p468_p3 = scmp.ne.s32.totalorder %s20_s22, %s467_s30  ;;  %p473_p5 = scmp.lt.s32.totalorder %s467_s30, %s467_s30 }
   0xb   :  { %p474_p6 = por %p473_p5, %p472_p4 }
   0xd   :  { %p475_p7 = pnand %p474_p6, %p468_p3 }
   0xf   :  { %478 = shalt.err (!%p475_p7)
}
  0x10   :  { %s506_s7 = smov 256   ;;  %s507_s8 = smov 16  }
  0x11   :  { %25 = dma.hbm_to_vmem [thread:$0]  %s673_s0, 2048, %s20_s22, [#allocation4], %s506_s7, %s506_s7, %s507_s8  }
  0x12   :  { %501 = dma.done.wait [#allocation4], 2048  }
  0x13   :  { %502 = vsyncadd [#allocation4], 4294965248  ;;  %v562_v0 = vld [vmem:[#allocation3 + $0x40] sm:$0xff]  ;;  %v564_v1 = vld [vmem:[#allocation3 + $0x48] sm:$0xff]  ;;  %v508_v27 = vmov 0.0|0.0   ;;  %vm509_vm0 = vmmov 0   ;;  %v106_v32 = vlaneseq }
  0x14   :  { %v566_v2 = vld [vmem:[#allocation3] sm:$0xff]  ;;  %v67_v3 = vadd.f32 %v564_v1, %v562_v0  ;;  %v570_v4 = vld [vmem:[#allocation3 + $0x8] sm:$0xff]  ;;  %v572_v5 = vld [vmem:[#allocation3 + $0x50] sm:$0xff]  ;;  %440 = vmatprep.subr.bf16.mxu0 %v508_v27  ;;  %v510_v31 = vmov 0.0   ;;  %vm117_vm1 = vcmask 130112   ;;  %vm124_vm2 = vcmask 195712  }
  0x15   :  { %v574_v6 = vld [vmem:[#allocation3 + $0x58] sm:$0xff]  ;;  %v55_v7 = vadd.f32 %v570_v4, %v566_v2  ;;  %v578_v8 = vld [vmem:[#allocation3 + $0x10] sm:$0xff]  ;;  %v586_v12 = vld [vmem:[#allocation3 + $0x60] sm:$0xff]  ;;  %432 = vmatprep.mubr.msk.f32.mxu0 %vm509_vm0, %v510_v31  ;;  %435 = vmatprep.subr.mxu1 %v510_v31  ;;  %v107_v34 = vand.u32 127, %v106_v32  ;;  %v622_v39 = vshrl.u32 %v106_v32, 7  ;;  %vm131_vm3 = vcmask 261312  }
  0x16   :  { %v580_v9 = vld [vmem:[#allocation3 + $0x18] sm:$0xff]  ;;  %68 = vadd.xlane.f32.xlu1 %v67_v3  ;;  %v70_v10 = vadd.f32 %v574_v6, %v572_v5  ;;  %v588_v13 = vld [vmem:[#allocation3 + $0x68] sm:$0xff]  ;;  %v590_v14 = vld [vmem:[#allocation3 + $0x20] sm:$0xff]  ;;  %437 = vmatprep.mubr.msk.f32.mxu1 %vm509_vm0, %v510_v31  ;;  %vm152_vm4 = vcmask 1041409   ;;  %vm154_vm5 = vcmask 261120   ;;  %vm244_vm6 = vcmask 1041408  }
  0x17   :  { %56 = vadd.xlane.f32.xlu0 %v55_v7  ;;  %v58_v11 = vadd.f32 %v580_v9, %v578_v8  ;;  %v592_v15 = vld [vmem:[#allocation3 + $0x28] sm:$0xff]  ;;  %v73_v16 = vadd.f32 %v588_v13, %v586_v12  ;;  %v598_v18 = vld [vmem:[#allocation3 + $0x70] sm:$0xff]  ;;  %v600_v19 = vld [vmem:[#allocation3 + $0x78] sm:$0xff]  ;;  %v112_v36 = vadd.s32 4294967288, %v107_v34  ;;  %v119_v38 = vadd.s32 4294967280, %v107_v34 }
  0x18   :  { %v61_v17 = vadd.f32 %v592_v15, %v590_v14  ;;  %v602_v20 = vld [vmem:[#allocation3 + $0x30] sm:$0xff]  ;;  %v604_v21 = vld [vmem:[#allocation3 + $0x38] sm:$0xff]  ;;  %v76_v22 = vadd.f32 %v600_v19, %v598_v18  ;;  %v87_v24 = vld [vmem:[%s674_s1] sm:$0xff]  ;;  %v126_v43 = vadd.s32 4294967272, %v107_v34  ;;  %v110_v47 = vsub.s32 %v107_v34, %v622_v39 }
  0x19   :  { %v64_v23 = vadd.f32 %v604_v21, %v602_v20  ;;  %v88_v25 = vld [vmem:[%s674_s1 + $0x8] sm:$0xff]  ;;  %v89_v28 = vld [vmem:[%s674_s1 + $0x10] sm:$0xff]  ;;  %v90_v29 = vld [vmem:[%s674_s1 + $0x18] sm:$0xff]  ;;  %v115_v41 = vsub.s32 %v112_v36, %v622_v39  ;;  %v122_v45 = vsub.s32 %v119_v38, %v622_v39  ;;  %vm240_vm8 = vcmask 15360  }
  0x1a   :  { %71 = vadd.xlane.f32.xlu1 %v70_v10  ;;  %v441_v26 = vpack.c.bf16 %v88_v25, %v87_v24  ;;  %v444_v30 = vpack.c.bf16 %v90_v29, %v89_v28  ;;  %v129_v54 = vsub.s32 %v126_v43, %v622_v39  ;;  %v232_v25 = vld [vmem:[%s676_s3] sm:$0x3]  ;;  %v229_v28 = vstv %s678_s5 }
  0x1b   :  { %59 = vadd.xlane.f32.xlu0 %v58_v11  ;;  %436 = vmatpush3.msk.msra.mxu1 %vm244_vm6, %v232_v25 }
  0x1c   :  { %442 = vmatpush3.bf16.msra.mxu0 %v441_v26  ;;  %v411_v26 = vld [vmem:[%s675_s2] ss:$0 sm:$0xff]  ;;  %s511_s2 = smov [#allocation6]  }
  0x1d   :  { %443 = vmatprep.subr.bf16.mxu0 %v508_v27 }
  0x1e   :  { %74 = vadd.xlane.f32.xlu1 %v73_v16 }
  0x1f   :  { %62 = vadd.xlane.f32.xlu0 %v61_v17 }
  0x20   :  { %445 = vmatpush3.bf16.msra.mxu0 %v444_v30 }
  0x22   :  { %77 = vadd.xlane.f32.xlu1 %v76_v22 }
  0x23   :  { %65 = vadd.xlane.f32.xlu0 %v64_v23 }
  0xa3   :  { %v69_v33 = vpop.xlane.xlu1 %68 }
  0xa4   :  { %v57_v35 = vpop.xlane.xlu0 %56  ;;  %v83_v48 = vmul.f32 0.00390625, %v69_v33  ;;  %v413_v33 = vld [vmem:[%s677_s4] ss:$0 sm:$0xff]  ;;  %s399_s4 = sshll.u32 %s511_s2, 4  ;;  %s400_s4 = int_to_ptr.vmem [resolvable:$true] %s399_s4 }
  0xa5   :  { %v79_v51 = vmul.f32 0.00390625, %v57_v35  ;;  %s479_s5 = scalar_lea.vmem %s400_s4, 2048  ;;  %p484_p9 = scmp.lt.s32.totalorder %s400_s4, %s400_s4 }
  0xa6   :  { %v136_v58 = vrot.slane %v83_v48, %v110_v47  ;;  %p480_p8 = scmp.ne.s32.totalorder %s400_s4, %s479_s5  ;;  %p485_p10 = scmp.lt.s32.totalorder %s479_s5, %s479_s5 }
  0xa7   :  { %v72_v37 = vpop.xlane.xlu1 %71  ;;  %v111_v62 = vrot.slane %v79_v51, %v110_v47 }
  0xa8   :  { %v60_v40 = vpop.xlane.xlu0 %59  ;;  %v84_v42 = vmul.f32 0.00390625, %v72_v37  ;;  %p486_p11 = por %p485_p10, %p484_p9 }
  0xa9   :  { %v80_v44 = vmul.f32 0.00390625, %v60_v40 }
  0xaa   :  { %v140_v53 = vrot.slane %v84_v42, %v115_v41  ;;  %p487_p12 = pnand %p486_p11, %p480_p8 }
  0xab   :  { %v75_v46 = vpop.xlane.xlu1 %74  ;;  %v116_v55 = vrot.slane %v80_v44, %v115_v41  ;;  %v326_v41 = vsub.s32 0, %v622_v39  ;;  %v345_v44 = vsub.s32 1, %v622_v39 }
  0xac   :  { %v85_v49 = vmul.f32 0.00390625, %v75_v46  ;;  %v63_v50 = vpop.xlane.xlu0 %62  ;;  %v141_v3 = vsel %vm117_vm1, %v140_v53, %v136_v58 }
  0xad   :  { %v81_v52 = vmul.f32 0.00390625, %v63_v50  ;;  %v118_v10 = vsel %vm117_vm1, %v116_v55, %v111_v62 }
  0xae   :  { %v145_v56 = vrot.slane %v85_v49, %v122_v45 }
  0xaf   :  { %v78_v57 = vpop.xlane.xlu1 %77  ;;  %v123_v59 = vrot.slane %v81_v52, %v122_v45 }
  0xb0   :  { %v86_v60 = vmul.f32 0.00390625, %v78_v57  ;;  %v66_v61 = vpop.xlane.xlu0 %65  ;;  %v146_v11 = vsel %vm124_vm2, %v145_v56, %v141_v3 }
  0xb1   :  { %v82_v63 = vmul.f32 0.00390625, %v66_v61  ;;  %v125_v17 = vsel %vm124_vm2, %v123_v59, %v118_v10 }
  0xb2   :  { %v150_v7 = vrot.slane %v86_v60, %v129_v54 }
  0xb3   :  { %v130_v16 = vrot.slane %v82_v63, %v129_v54 }
  0xb4   :  { %v151_v22 = vsel %vm131_vm3, %v150_v7, %v146_v11 }
  0xb5   :  { %v132_v23 = vsel %vm131_vm3, %v130_v16, %v125_v17 }
  0xb6   :  { %v153_v24 = vsel %vm152_vm4, %v151_v22, %v132_v23 }
  0xb7   :  { %433 = vmatmul.mubr.msk.f32.vlgmr.msra.gmra.mrb[0].mxu0 %vm154_vm5, %v153_v24 }
 0x18a   :  { %v223_v27 = vpop.f32.mrb[0].mxu0 }
 0x18b   :  { %v224_v29 = vadd.f32 %v411_v26, %v223_v27  ;;  %v434_v30 = vpop.f32.mrb[1].mxu0 }
 0x18d   :  { %vm228_vm7 = vcmp.gt.f32.partialorder %v224_v29, 0.0  ;;  %v230_v31 = vmul.f32 %v229_v28, %v224_v29 }
 0x18f   :  { %v231_v32 = vsel %vm228_vm7, %v224_v29, %v230_v31 }
 0x190   :  { %438 = vmatmul.mubr.msk.f32.vlgmr.msra.gmra.mrb[0].mxu1 %vm240_vm8, %v231_v32 }
 0x263   :  { %v314_v34 = vpop.f32.mrb[0].mxu1 }
 0x264   :  { %v315_v35 = vadd.f32 %v413_v33, %v314_v34  ;;  %v439_v36 = vpop.f32.mrb[1].mxu1 }
 0x266   :  { %v416_v37 = vmul.f32 -1.442695, %v315_v35 }
 0x268   :  { %453 = vpow2.f32 %v416_v37 }
 0x272   :  { %v454_v38 = vpop.eup %453 }
 0x273   :  { %v321_v40 = vadd.f32 1.0, %v454_v38 }
 0x275   :  { %455 = vrcp.f32 %v321_v40 }
 0x27f   :  { %v456_v42 = vpop.eup %455 }
 0x280   :  { %v327_v43 = vrot.slane %v456_v42, %v326_v41  ;;  %v346_v45 = vrot.slane %v456_v42, %v345_v44 }
 0x282   :  { %333 = vbcast.lane.b32.xlu1 %v327_v43, 264  ;;  %329 = vbcast.lane.b32.xlu0 %v327_v43, 256 }
 0x286   :  { %337 = vbcast.lane.b32.xlu1 %v327_v43, 272  ;;  %348 = vbcast.lane.b32.xlu0 %v346_v45, 256 }
 0x28a   :  { %341 = vbcast.lane.b32.xlu1 %v327_v43, 280  ;;  %356 = vbcast.lane.b32.xlu0 %v346_v45, 272 }
 0x28e   :  { %352 = vbcast.lane.b32.xlu1 %v346_v45, 264 }
 0x292   :  { %360 = vbcast.lane.b32.xlu1 %v346_v45, 280 }
 0x2f4   :  { %v334_v46 = vpop.permute.xlu1 %333  ;;  %v330_v47 = vpop.permute.xlu0 %329 }
 0x2f5   :  { %v364_v48 = vmul.f32 %v334_v46, %v578_v8  ;;  %v365_v49 = vmul.f32 %v334_v46, %v580_v9  ;;  %v362_v50 = vmul.f32 %v330_v47, %v566_v2  ;;  %v363_v51 = vmul.f32 %v330_v47, %v570_v4 }
 0x2f7   :  { %380 = vst [vmem:[#allocation6 + $0x10] sm:$0xff] %v364_v48  ;;  %381 = vst [vmem:[#allocation6 + $0x18] sm:$0xff] %v365_v49 }
 0x2f8   :  { %378 = vst [vmem:[#allocation6] sm:$0xff] %v362_v50  ;;  %379 = vst [vmem:[#allocation6 + $0x8] sm:$0xff] %v363_v51  ;;  %v338_v39 = vpop.permute.xlu1 %337  ;;  %v349_v52 = vpop.permute.xlu0 %348 }
 0x2f9   :  { %v366_v53 = vmul.f32 %v338_v39, %v590_v14  ;;  %v367_v54 = vmul.f32 %v338_v39, %v592_v15  ;;  %v370_v55 = vmul.f32 %v349_v52, %v562_v0  ;;  %v371_v8 = vmul.f32 %v349_v52, %v564_v1 }
 0x2fb   :  { %382 = vst [vmem:[#allocation6 + $0x20] sm:$0xff] %v366_v53  ;;  %383 = vst [vmem:[#allocation6 + $0x28] sm:$0xff] %v367_v54 }
 0x2fc   :  { %386 = vst [vmem:[#allocation6 + $0x40] sm:$0xff] %v370_v55  ;;  %387 = vst [vmem:[#allocation6 + $0x48] sm:$0xff] %v371_v8  ;;  %v342_v2 = vpop.permute.xlu1 %341  ;;  %v357_v4 = vpop.permute.xlu0 %356 }
 0x2fd   :  { %v368_v9 = vmul.f32 %v342_v2, %v602_v20  ;;  %v369_v56 = vmul.f32 %v342_v2, %v604_v21  ;;  %v374_v57 = vmul.f32 %v357_v4, %v586_v12  ;;  %v375_v14 = vmul.f32 %v357_v4, %v588_v13 }
 0x2ff   :  { %384 = vst [vmem:[#allocation6 + $0x30] sm:$0xff] %v368_v9  ;;  %385 = vst [vmem:[#allocation6 + $0x38] sm:$0xff] %v369_v56 }
 0x300   :  { %390 = vst [vmem:[#allocation6 + $0x60] sm:$0xff] %v374_v57  ;;  %391 = vst [vmem:[#allocation6 + $0x68] sm:$0xff] %v375_v14  ;;  %v353_v0 = vpop.permute.xlu1 %352 }
 0x301   :  { %v372_v1 = vmul.f32 %v353_v0, %v572_v5  ;;  %v373_v15 = vmul.f32 %v353_v0, %v574_v6 }
 0x303   :  { %388 = vst [vmem:[#allocation6 + $0x50] sm:$0xff] %v372_v1  ;;  %389 = vst [vmem:[#allocation6 + $0x58] sm:$0xff] %v373_v15 }
 0x304   :  { %v361_v20 = vpop.permute.xlu1 %360 }
 0x305   :  { %v376_v21 = vmul.f32 %v361_v20, %v598_v18  ;;  %v377_v12 = vmul.f32 %v361_v20, %v600_v19 }
 0x307   :  { %392 = vst [vmem:[#allocation6 + $0x70] sm:$0xff] %v376_v21  ;;  %393 = vst [vmem:[#allocation6 + $0x78] sm:$0xff] %v377_v12 }
 0x308   :  { %490 = shalt.err (!%p487_p12)
}
 0x309   :  { %s491_s26 = scalar_lea.hbm %s679_s6, 2048 }
 0x30a   :  { %p492_p13 = scmp.ne.s32.totalorder %s679_s6, %s491_s26  ;;  %p495_p0 = scmp.lt.u32.totalorder %s491_s26, %s679_s6 }
 0x30c   :  { %p497_p1 = pnand %p495_p0, %p492_p13 }
 0x30e   :  { %500 = shalt.err (!%p497_p1)
}
 0x30f   :  { %405 = dma.vmem_to_hbm [thread:$0]  %s400_s4, 2048, %s679_s6, [#allocation5], %s506_s7, %s506_s7, %s507_s8  }
 0x310   :  { %503 = dma.done.wait [#allocation5], 2048  }
 0x311   :  { %504 = vsyncadd [#allocation5], 4294965248 }
 0x312   :  { %409 = vsyncpa [#allocation4], 1 }
 0x313   :  { %410 = vsyncpa [#allocation5], 1 }

</bundles_post_ra>
